<compile_context>
chip_gen: v5e
topology: v5e:2x2
jax: 0.10.0
libtpu: 0.0.40
codegen_flags: <defaults>
</compile_context>

<pallas_src>
import functools

import jax
import jax.numpy as jnp
from jax.experimental import pallas as pl
from jax.experimental.pallas import tpu as pltpu

SCALE_FACTOR = 10.0
EPS = 1e-5


def _round_up(x, m):
    return ((x + m - 1) // m) * m


def _model_kernel(data_ref, wb_ref, wnct_ref, out_ref):
    # backbone: (TB, D_in) @ (D_in, 160) -> (TB, 160), MXU, f32 accumulate
    h = jnp.dot(data_ref[...], wb_ref[...], preferred_element_type=jnp.float32)

    # un-normalized cosine scores: second MXU matmul issued immediately
    # (classifier weights were pre-normalized + pre-transposed in the wrapper,
    #  so nothing serializes this behind norm/transpose work)
    cos_un = jnp.dot(h, wnct_ref[...], preferred_element_type=jnp.float32)

    # per-row inverse feature norm with the 10x scale folded in; applied to the
    # small (TB, C_pad) output instead of the (TB, 160) hidden.
    # approx=False keeps full precision for the 1e-4 tolerance check;
    # approx=True would move the divide onto the otherwise-idle EUP slot.
    norm = jnp.sqrt(jnp.sum(h * h, axis=1, keepdims=True))            # (TB, 1)
    inv = SCALE_FACTOR * pl.reciprocal(norm + EPS, approx=False)

    out_ref[...] = (cos_un * inv).astype(out_ref.dtype)


@functools.partial(jax.jit, static_argnames=("tile_b",))
def model_forward(data, w_backbone, w_cls, *, tile_b=256):
    """Fused forward: backbone linear -> distLinear (cosine classifier x10)."""
    B, D_in = data.shape
    C, H = w_cls.shape
    assert w_backbone.shape == (D_in, H)

    # ---- hoisted, static-per-call preprocessing (outside the kernel) --------
    # L2-normalize classifier rows once; hand the kernel the (H, C_pad) layout.
    wc32 = w_cls.astype(jnp.float32)
    w_norm = jnp.sqrt(jnp.sum(wc32 * wc32, axis=1, keepdims=True))     # (C, 1)
    w_n_t = (wc32 / (w_norm + EPS)).T                                  # (H, C)

    # pad classes to a lane-dense multiple of 128 (zero columns -> zero scores)
    C_pad = max(128, _round_up(C, 128))
    if C_pad != C:
        w_n_t = jnp.pad(w_n_t, ((0, 0), (0, C_pad - C)))

    # batch tiling: full-batch block when small, otherwise tile_b-row tiles
    tb = B if B <= tile_b else tile_b
    B_pad = _round_up(B, tb)
    x = data if B_pad == B else jnp.pad(data, ((0, B_pad - B), (0, 0)))
    x = x.astype(jnp.float32)

    grid = (B_pad // tb,)

    out = pl.pallas_call(
        _model_kernel,
        out_shape=jax.ShapeDtypeStruct((B_pad, C_pad), jnp.float32),
        grid=grid,
        in_specs=[
            pl.BlockSpec((tb, D_in), lambda i: (i, 0)),     # batch-tiled data
            pl.BlockSpec((D_in, H), lambda i: (0, 0)),      # resident backbone W
            pl.BlockSpec((H, C_pad), lambda i: (0, 0)),     # resident normalized W_cls^T
        ],
        out_specs=pl.BlockSpec((tb, C_pad), lambda i: (i, 0)),
        compiler_params=pltpu.CompilerParams(
            dimension_semantics=("parallel",),   # shard batch across v7x's 2 TCs
            vmem_limit_bytes=32 << 20,           # safe under v7x's 64 MiB physical VMEM
        ),
    )(x, w_backbone.astype(jnp.float32), w_n_t)

    return out[:B, :C]


def model_forward_ref(data, w_backbone, w_cls):
    # pure-JAX reference mirroring the PyTorch semantics
    h = data @ w_backbone
    h_n = h / (jnp.linalg.norm(h, axis=1, keepdims=True) + EPS)
    w_n = w_cls / (jnp.linalg.norm(w_cls, axis=1, keepdims=True) + EPS)
    return SCALE_FACTOR * (h_n @ w_n.T)


if __name__ == "__main__":
    B, D_IN, HIDDEN, NUM_CLASSES = 8, 64, 160, 16

    key = jax.random.PRNGKey(0)
    k_data, k_wb, k_wc = jax.random.split(key, 3)

    data = jax.random.normal(k_data, (B, D_IN), dtype=jnp.float32)
    # deterministic "backbone" projection weights (D_in -> 160)
    w_backbone = jax.random.normal(k_wb, (D_IN, HIDDEN), dtype=jnp.float32) * 0.05
    # distLinear classifier weight, nn.Linear convention: (out, in)
    w_cls = jax.random.normal(k_wc, (NUM_CLASSES, HIDDEN), dtype=jnp.float32) * 0.05

    scores = model_forward(data, w_backbone, w_cls)
    jax.block_until_ready(scores)

    ref = model_forward_ref(data, w_backbone, w_cls)
    assert scores.shape == (B, NUM_CLASSES)
    assert jnp.allclose(scores, ref, atol=1e-4, rtol=1e-4), "mismatch vs reference"

    print("KERNEL_OK")
</pallas_src>

<mosaic_0001>
module attributes {stable_mosaic.version = 11 : i64} {
  func.func @_model_kernel(%arg0: i32, %arg1: memref<8x64xf32, #tpu.memory_space<vmem>>, %arg2: memref<64x160xf32, #tpu.memory_space<vmem>>, %arg3: memref<160x128xf32, #tpu.memory_space<vmem>>, %arg4: memref<8x128xf32, #tpu.memory_space<vmem>>) attributes {dimension_semantics = [#tpu.dimension_semantics<parallel>], iteration_bounds = array<i64: 1>, scalar_prefetch = 0 : i64, scratch_operands = 0 : i64, tpu.core_type = #tpu.core_type<tc>, window_params = [{transform_indices = @transform_0, window_bounds = array<i64: 8, 64>}, {pipeline_mode = #tpu.pipeline_mode<synchronous>, transform_indices = @transform_1, window_bounds = array<i64: 64, 160>}, {pipeline_mode = #tpu.pipeline_mode<synchronous>, transform_indices = @transform_2, window_bounds = array<i64: 160, 128>}, {transform_indices = @transform_3, window_bounds = array<i64: 8, 128>}]} {
    %c0 = arith.constant 0 : index
    %c0_0 = arith.constant 0 : index
    %0 = vector.load %arg1[%c0, %c0_0] : memref<8x64xf32, #tpu.memory_space<vmem>>, vector<8x64xf32>
    %c0_1 = arith.constant 0 : index
    %c0_2 = arith.constant 0 : index
    %1 = vector.load %arg2[%c0_1, %c0_2] : memref<64x160xf32, #tpu.memory_space<vmem>>, vector<64x160xf32>
    %cst = arith.constant dense<0.000000e+00> : vector<8x160xf32>
    %2 = tpu.matmul %0, %1, %cst {dimension_numbers = #tpu.dot_dimension_numbers<[1], [0], [0], [1], [0, 0, 1, 1], [], []>} : vector<8x64xf32>, vector<64x160xf32>, vector<8x160xf32> -> vector<8x160xf32>
    %c0_3 = arith.constant 0 : index
    %c0_4 = arith.constant 0 : index
    %3 = vector.load %arg3[%c0_3, %c0_4] : memref<160x128xf32, #tpu.memory_space<vmem>>, vector<160x128xf32>
    %cst_5 = arith.constant dense<0.000000e+00> : vector<8x128xf32>
    %4 = tpu.matmul %2, %3, %cst_5 {dimension_numbers = #tpu.dot_dimension_numbers<[1], [0], [0], [1], [0, 0, 1, 1], [], []>} : vector<8x160xf32>, vector<160x128xf32>, vector<8x128xf32> -> vector<8x128xf32>
    %5 = arith.mulf %2, %2 : vector<8x160xf32>
    %cst_6 = arith.constant dense<0.000000e+00> : vector<8xf32>
    %6 = vector.multi_reduction <add>, %5, %cst_6 [1] : vector<8x160xf32> to vector<8xf32>
    %7 = vector.shape_cast %6 : vector<8xf32> to vector<8x1xf32>
    %8 = math.sqrt %7 : vector<8x1xf32>
    %cst_7 = arith.constant 9.99999974E-6 : f32
    %9 = vector.broadcast %cst_7 : f32 to vector<8x1xf32>
    %10 = arith.addf %8, %9 : vector<8x1xf32>
    %11 = tpu.reciprocal %10 : vector<8x1xf32> -> vector<8x1xf32>
    %cst_8 = arith.constant 1.000000e+01 : f32
    %12 = vector.broadcast %cst_8 : f32 to vector<8x1xf32>
    %13 = arith.mulf %12, %11 : vector<8x1xf32>
    %14 = vector.broadcast %13 : vector<8x1xf32> to vector<8x128xf32>
    %15 = arith.mulf %4, %14 : vector<8x128xf32>
    %c0_9 = arith.constant 0 : index
    %c0_10 = arith.constant 0 : index
    %16 = vector.load %arg4[%c0_9, %c0_10] : memref<8x128xf32, #tpu.memory_space<vmem>>, vector<8x128xf32>
    tpu.vector_store %arg4[%c0_9, %c0_10], %15 {strides = array<i32>} : memref<8x128xf32, #tpu.memory_space<vmem>>, vector<8x128xf32>,
    return
  }
  func.func @transform_0(%arg0: i32) -> (i32, i32) {
    %c0_i32 = arith.constant 0 : i32
    %c0_i32_0 = arith.constant 0 : i32
    return %arg0, %c0_i32 : i32, i32
  }
  func.func @transform_1(%arg0: i32) -> (i32, i32) {
    %c0_i32 = arith.constant 0 : i32
    %c0_i32_0 = arith.constant 0 : i32
    %c0_i32_1 = arith.constant 0 : i32
    return %c0_i32, %c0_i32_0 : i32, i32
  }
  func.func @transform_2(%arg0: i32) -> (i32, i32) {
    %c0_i32 = arith.constant 0 : i32
    %c0_i32_0 = arith.constant 0 : i32
    %c0_i32_1 = arith.constant 0 : i32
    return %c0_i32, %c0_i32_0 : i32, i32
  }
  func.func @transform_3(%arg0: i32) -> (i32, i32) {
    %c0_i32 = arith.constant 0 : i32
    %c0_i32_0 = arith.constant 0 : i32
    return %arg0, %c0_i32 : i32, i32
  }
}

</mosaic_0001>

<bundles_post_ra>
// kernel: model_forward.1
= control target key start
LH: loop header
LB: loop body
LE: loop exit
PB: predicated region body
PF: predicated region fallthrough
CT: control target
= control target key end

     0   :  { %s361_s0 = inlined_call_operand.vmem [shape: f32[8,64], index: 0, kind: input, shape index: {}]   ;;  %s362_s1 = inlined_call_operand.vmem [shape: f32[64,160], index: 1, kind: input, shape index: {}]   ;;  %s363_s2 = inlined_call_operand.vmem [shape: f32[160,128], index: 2, kind: input, shape index: {}]   ;;  %s364_s3 = inlined_call_operand.hbm [shape: f32[8,128], index: 3, kind: output, shape index: {}]  }
   0x1   :  { %v30_v0 = vld [vmem:[%s362_s1 + $0x70] sm:$0xff]  ;;  %v31_v1 = vld [vmem:[%s362_s1 + $0x78] sm:$0xff]  ;;  %v28_v2 = vld [vmem:[%s362_s1 + $0x60] sm:$0xff] }
   0x2   :  { %44 = vmatpush.msra.mxu0 %v30_v0  ;;  %64 = vmatpush.msra.mxu1 %v31_v1  ;;  %v29_v3 = vld [vmem:[%s362_s1 + $0x68] sm:$0xff]  ;;  %v26_v4 = vld [vmem:[%s362_s1 + $0x50] sm:$0xff]  ;;  %v27_v5 = vld [vmem:[%s362_s1 + $0x58] sm:$0xff] }
   0x3   :  { %v24_v6 = vld [vmem:[%s362_s1 + $0x40] sm:$0xff]  ;;  %v25_v7 = vld [vmem:[%s362_s1 + $0x48] sm:$0xff]  ;;  %v91_v8 = vld [vmem:[%s363_s2 + $0x78] sm:$0xff] }
   0x4   :  { %45 = vmatpush.msra.mxu0 %v28_v2  ;;  %65 = vmatpush.msra.mxu1 %v29_v3  ;;  %v22_v9 = vld [vmem:[%s362_s1 + $0x30] sm:$0xff]  ;;  %v23_v10 = vld [vmem:[%s362_s1 + $0x38] sm:$0xff]  ;;  %v89_v12 = vld [vmem:[%s363_s2 + $0x68] sm:$0xff] }
   0x5   :  { %100 = vmatpush.msra.mxu2 %v91_v8  ;;  %v90_v11 = vld [vmem:[%s363_s2 + $0x70] sm:$0xff]  ;;  %v20_v13 = vld [vmem:[%s362_s1 + $0x20] sm:$0xff]  ;;  %v21_v14 = vld [vmem:[%s362_s1 + $0x28] sm:$0xff] }
   0x6   :  { %46 = vmatpush.msra.mxu0 %v26_v4  ;;  %66 = vmatpush.msra.mxu1 %v27_v5  ;;  %v88_v15 = vld [vmem:[%s363_s2 + $0x60] sm:$0xff]  ;;  %v18_v16 = vld [vmem:[%s362_s1 + $0x10] sm:$0xff]  ;;  %v19_v17 = vld [vmem:[%s362_s1 + $0x18] sm:$0xff] }
   0x7   :  { %101 = vmatpush.msra.mxu2 %v90_v11  ;;  %v95_v18 = vld [vmem:[%s363_s2 + $0x98] sm:$0xff]  ;;  %v94_v20 = vld [vmem:[%s363_s2 + $0x90] sm:$0xff] }
   0x8   :  { %47 = vmatpush.msra.mxu0 %v24_v6  ;;  %67 = vmatpush.msra.mxu1 %v25_v7  ;;  %v87_v19 = vld [vmem:[%s363_s2 + $0x58] sm:$0xff] }
   0x9   :  { %102 = vmatpush.msra.mxu2 %v89_v12 }
   0xa   :  { %48 = vmatpush.msra.mxu0 %v22_v9  ;;  %68 = vmatpush.msra.mxu1 %v23_v10 }
   0xc   :  { %49 = vmatpush.msra.mxu0 %v20_v13  ;;  %69 = vmatpush.msra.mxu1 %v21_v14 }
   0xd   :  { %8 = vsyncpa [#allocation3], 0  ;;  %v16_v21 = vld [vmem:[%s362_s1] sm:$0xff]  ;;  %v17_v22 = vld [vmem:[%s362_s1 + $0x8] sm:$0xff]  ;;  %103 = vmatpush.msra.mxu2 %v88_v15  ;;  %132 = vmatpush.msra.mxu3 %v95_v18  ;;  %vm32_vm0 = vcmask 523264   ;;  %vm96_vm1 = vcmask 261120  }
   0xe   :  { %50 = vmatpush.msra.mxu0 %v18_v16  ;;  %70 = vmatpush.msra.mxu1 %v19_v17  ;;  %v15_v23 = vld [vmem:[%s361_s0] sm:$0xff]  ;;  %v86_v24 = vld [vmem:[%s363_s2 + $0x50] sm:$0xff]  ;;  %v93_v25 = vld [vmem:[%s363_s2 + $0x88] sm:$0xff]  ;;  %s183_s6 = sshll.u32 %s364_s3, 4  ;;  %s184_s6 = int_to_ptr.hbm [resolvable:$true] %s183_s6 }
   0xf   :  { %104 = vmatpush.msra.mxu2 %v87_v19  ;;  %133 = vmatpush.msra.mxu3 %v94_v20  ;;  %v85_v26 = vld [vmem:[%s363_s2 + $0x48] sm:$0xff]  ;;  %v84_v27 = vld [vmem:[%s363_s2 + $0x40] sm:$0xff]  ;;  %v83_v28 = vld [vmem:[%s363_s2 + $0x38] sm:$0xff] }
  0x10   :  { %51 = vmatpush.msra.mxu0 %v16_v21  ;;  %71 = vmatpush.msra.mxu1 %v17_v22  ;;  %v82_v29 = vld [vmem:[%s363_s2 + $0x30] sm:$0xff]  ;;  %v81_v30 = vld [vmem:[%s363_s2 + $0x28] sm:$0xff]  ;;  %v80_v31 = vld [vmem:[%s363_s2 + $0x20] sm:$0xff] }
  0x11   :  { %192 = vmatmul.msk.f32.vlgmr.msra.gmra.mxu0 %vm32_vm0, %v15_v23  ;;  %193 = vmatmul.msk.f32.vlgmr.msra.gmra.mxu1 %vm32_vm0, %v15_v23  ;;  %v79_v32 = vld [vmem:[%s363_s2 + $0x18] sm:$0xff]  ;;  %v78_v33 = vld [vmem:[%s363_s2 + $0x10] sm:$0xff]  ;;  %v77_v34 = vld [vmem:[%s363_s2 + $0x8] sm:$0xff] }
  0x12   :  { %105 = vmatpush.msra.mxu2 %v86_v24  ;;  %134 = vmatpush.msra.mxu3 %v93_v25  ;;  %v76_v35 = vld [vmem:[%s363_s2] sm:$0xff] }
  0x13   :  { %v92_v36 = vld [vmem:[%s363_s2 + $0x80] sm:$0xff]  ;;  %s226_s2 = smov [#allocation2]  }
  0x14   :  { %106 = vmatpush.msra.mxu2 %v85_v26  ;;  %135 = vmatpush.msra.mxu3 %v92_v36  ;;  %s181_s30 = sshll.u32 %s226_s2, 4  ;;  %s182_s30 = int_to_ptr.vmem [resolvable:$true] %s181_s30 }
  0x16   :  { %107 = vmatpush.msra.mxu2 %v84_v27 }
  0x18   :  { %108 = vmatpush.msra.mxu2 %v83_v28 }
  0x1a   :  { %109 = vmatpush.msra.mxu2 %v82_v29 }
  0x1c   :  { %110 = vmatpush.msra.mxu2 %v81_v30 }
  0x1e   :  { %111 = vmatpush.msra.mxu2 %v80_v31 }
  0x20   :  { %112 = vmatpush.msra.mxu2 %v79_v32 }
  0x22   :  { %113 = vmatpush.msra.mxu2 %v78_v33 }
  0x24   :  { %114 = vmatpush.msra.mxu2 %v77_v34 }
  0x26   :  { %115 = vmatpush.msra.mxu2 %v76_v35 }
  0x8e   :  { %v53_v37 = vpop.f32.mrf.mxu0  ;;  %v73_v38 = vpop.f32.mrf.mxu1 }
  0x8f   :  { %v140_v39 = vmul.f32 %v53_v37, %v53_v37  ;;  %v141_v40 = vmul.f32 %v73_v38, %v73_v38  ;;  %116 = vmatmul.f32.vlgmr.msra.gmra.mxu2 %v53_v37  ;;  %194 = vmatmul.msk.f32.vlgmr.msra.gmra.mxu3 %vm96_vm1, %v73_v38 }
  0x91   :  { %v142_v41 = vsel %vm96_vm1, %v141_v40, 0.0 }
  0x92   :  { %v143_v42 = vadd.f32 %v142_v41, %v140_v39 }
  0x94   :  { %144 = vadd.xlane.f32.xlu0 %v143_v42 }
 0x107   :  { %v145_v43 = vpop.xlane.xlu0 %144 }
 0x108   :  { %196 = vrsqrt.f32 %v145_v43  ;;  %vm153_vm2 = vcmp.eq.f32.partialorder %v145_v43, inf  ;;  %v156_v51 = vand.u32 2147483648, %v145_v43  ;;  %vm155_vm3 = vcmp.eq.f32.partialorder %v145_v43, 0.0 }
 0x10e   :  { %v197_v44 = vpop.eup %196 }
 0x10f   :  { %v147_v45 = vmul.f32 %v197_v44, %v145_v43 }
 0x111   :  { %v148_v46 = vmul.f32 %v197_v44, %v147_v45 }
 0x112   :  { %v117_v62 = vpop.f32.mrf.mxu2  ;;  %v137_v63 = vpop.f32.mrf.mxu3 }
 0x113   :  { %v149_v47 = vmul.f32 0.5, %v148_v46  ;;  %v138_v3 = vadd.f32 %v137_v63, %v117_v62 }
 0x115   :  { %v150_v48 = vsub.f32 1.5, %v149_v47 }
 0x117   :  { %v151_v49 = vmul.f32 %v197_v44, %v150_v48 }
 0x119   :  { %v152_v50 = vmul.f32 %v151_v49, %v145_v43 }
 0x11b   :  { %v154_v52 = vsel %vm153_vm2, %v145_v43, %v152_v50 }
 0x11c   :  { %v157_v53 = vsel %vm155_vm3, %v156_v51, %v154_v52 }
 0x11d   :  { %v158_v54 = vadd.f32 1e-05, %v157_v53 }
 0x11f   :  { %198 = vrcp.f32 %v158_v54  ;;  %v170_v58 = vand.u32 2147483648, %v158_v54  ;;  %v168_v60 = vand.u32 2147483647, %v158_v54  ;;  %vm164_vm5 = vweird.f32 %v158_v54 }
 0x121   :  { %v171_v0 = vor.u32 1.1754944e-38, %v170_v58  ;;  %vm169_vm7 = vcmp.eq.f32.partialorder %v168_v60, 8.507059e+37 }
 0x125   :  { %v199_v55 = vpop.eup %198 }
 0x126   :  { %v160_v56 = vmul.f32 %v199_v55, %v158_v54  ;;  %vm165_vm4 = vweird.f32 %v199_v55 }
 0x127   :  { %vm166_vm6 = vmor %vm164_vm5, %vm165_vm4 }
 0x128   :  { %v161_v57 = vsub.f32 1.0, %v160_v56 }
 0x12a   :  { %v162_v59 = vmul.f32 %v199_v55, %v161_v57 }
 0x12c   :  { %v163_v61 = vadd.f32 %v199_v55, %v162_v59 }
 0x12e   :  { %v167_v1 = vsel %vm166_vm6, %v199_v55, %v163_v61 }
 0x12f   :  { %v172_v2 = vsel %vm169_vm7, %v171_v0, %v167_v1 }
 0x130   :  { %v173_v4 = vmul.f32 10.0, %v172_v2 }
 0x132   :  { %v174_v5 = vmul.f32 %v173_v4, %v138_v3 }
 0x134   :  { %175 = vst [vmem:[#allocation2] sm:$0xff] %v174_v5 }
 0x135   :  { %186 = dma.vmem_to_hbm [thread:$0]  %s182_s30, 128, %s184_s6, [#allocation3]  }
 0x136   :  { %224 = dma.done.wait [#allocation3], 128  }
 0x137   :  { %225 = vsyncadd [#allocation3], 4294967168 }
 0x138   :  { %191 = vsyncpa [#allocation3], 1 }

</bundles_post_ra>
